<compile_context>
chip_gen: v7x
topology: tpu7x:2x2x1
jax: 0.10.0
libtpu: 0.0.40
codegen_flags: <defaults>
</compile_context>

<pallas_src>
import functools

import jax
import jax.numpy as jnp
from jax.experimental import pallas as pl
from jax.experimental.pallas import tpu as pltpu


# ----------------------------------------------------------------------------
# Buffer construction — plain JAX glue, deterministic.
# ----------------------------------------------------------------------------
def make_positional_encoding(d_model: int, max_len: int) -> jnp.ndarray:
    position = jnp.arange(0, max_len, dtype=jnp.float32)[:, None]           # (L, 1)
    div_term = jnp.exp(
        jnp.arange(0, d_model, 2, dtype=jnp.float32)
        * (-jnp.log(jnp.float32(10000.0)) / d_model)
    )                                                                        # (D/2,)
    pe = jnp.zeros((max_len, d_model), dtype=jnp.float32)
    pe = pe.at[:, 0::2].set(jnp.sin(position * div_term))
    pe = pe.at[:, 1::2].set(jnp.cos(position * div_term))
    return pe[None, :, :]                                                    # (1, L, D)


# ----------------------------------------------------------------------------
# Counter-based hash RNG (lowbias32).  Pure jnp -> lowers on TPU Mosaic and in
# interpret mode.  Bits depend only on (seed, absolute element index), so the
# dropout mask is invariant to the tiling and reproducible on the host.
# ----------------------------------------------------------------------------
def _uniform_bits(shape, row0, col0, seed_u32, row_stride):
    rows = jax.lax.broadcasted_iota(jnp.int32, shape, 0).astype(jnp.uint32) + row0
    cols = jax.lax.broadcasted_iota(jnp.int32, shape, 1).astype(jnp.uint32) + col0
    x = rows * jnp.uint32(row_stride) + cols
    x = x ^ (seed_u32 * jnp.uint32(0x9E3779B9) + jnp.uint32(0x85EBCA6B))
    x = (x ^ (x >> 16)) * jnp.uint32(0x7FEB352D)
    x = (x ^ (x >> 15)) * jnp.uint32(0x846CA68B)
    x = x ^ (x >> 16)
    return x


# ----------------------------------------------------------------------------
# Pallas kernel: (x + pe) followed by (optional, training-mode) dropout.
# Tiles are lane-dense 2-D blocks of the flattened (B, S*D) view.
# ----------------------------------------------------------------------------
def _pe_dropout_kernel(seed_ref, x_ref, pe_ref, o_ref, *,
                       p: float, training: bool,
                       block_rows: int, block_cols: int, row_stride: int):
    # x_ref/o_ref: (TB, TL), pe_ref: (1, TL) — broadcast add over rows.
    y = x_ref[...] + pe_ref[...]

    if training and p > 0.0:
        # Inverted dropout: keep with prob (1-p), scale kept values by 1/(1-p).
        # TODO(synk): PyTorch's exact dropout RNG stream cannot be bit-reproduced;
        # the statistical semantics (mask prob p, 1/(1-p) scaling) are implemented.
        row0 = (pl.program_id(0) * block_rows).astype(jnp.uint32)
        col0 = (pl.program_id(1) * block_cols).astype(jnp.uint32)
        seed_u = seed_ref[0].astype(jnp.uint32)
        bits = _uniform_bits(y.shape, row0, col0, seed_u, row_stride)
        thr = jnp.uint32(min(int(round(p * 2.0 ** 32)), 0xFFFFFFFF))
        scale = jnp.float32(1.0 / (1.0 - p))
        o_ref[...] = (y * jnp.where(bits >= thr, scale, jnp.float32(0.0))
                      ).astype(o_ref.dtype)
    else:
        o_ref[...] = y.astype(o_ref.dtype)


def _choose_tiles(n_rows: int, n_cols: int, elem_bytes: int = 4,
                  target_bytes: int = 2 * 1024 * 1024):
    """Pick a (row, lane) tile of roughly `target_bytes`, obeying the
    (8, 128)-divisible-or-full-dim BlockSpec constraint."""
    # Lane tile: full width if small enough, else a 128-multiple slice.
    tl_cap = max(128, target_bytes // (8 * elem_bytes))
    if n_cols <= tl_cap:
        tl = n_cols
    else:
        tl = (tl_cap // 128) * 128
    # Row tile: as many rows as fit in the target, multiple of 8 (or full dim).
    rows_fit = max(1, target_bytes // (tl * elem_bytes))
    if rows_fit >= n_rows:
        tb = n_rows
    else:
        tb = max(8, (rows_fit // 8) * 8)
        if tb >= n_rows:
            tb = n_rows
    return tb, tl


def positional_encoding_forward(
    x: jnp.ndarray,
    pe: jnp.ndarray,
    *,
    p: float = 0.1,
    training: bool = True,
    seed: int = 0,
) -> jnp.ndarray:
    """Pallas implementation of PositionalEncoding.forward.

    x : (B, S, D) float
    pe: (1, max_len, D) float32 with S == max_len (required by the original
        module's broadcasting, since pe[:x.size(0)] is a no-op on a size-1 dim).
    """
    assert x.ndim == 3, "x must be (batch, seq, d_model)"
    B, S, D = x.shape
    # Mirror the PyTorch slice pe[:x.size(0), :] — a no-op because pe.shape[0] == 1.
    pe_sliced = pe[: max(1, min(B, pe.shape[0]))]
    assert pe_sliced.shape == (1, S, D), (
        "broadcast in `x + pe` requires seq_len == max_len (as in the original module)"
    )

    # Lane-dense flatten: (B, S, D) -> (B, S*D), pe -> (1, S*D).
    L = S * D
    x2 = x.reshape(B, L)
    pe2 = pe_sliced.reshape(1, L).astype(x.dtype)
    # NOTE: on v5e with bf16 inputs, upcasting to f32 here avoids bf16-emulation
    # VALU overhead; v6e/v7x handle bf16 natively.  Demo uses f32.

    tb, tl = _choose_tiles(B, L, elem_bytes=x2.dtype.itemsize)
    grid = (pl.cdiv(B, tb), pl.cdiv(L, tl))

    kernel = functools.partial(
        _pe_dropout_kernel,
        p=float(p), training=bool(training),
        block_rows=tb, block_cols=tl, row_stride=L,
    )
    seed_arr = jnp.asarray([seed], dtype=jnp.int32)

    grid_spec = pltpu.PrefetchScalarGridSpec(
        num_scalar_prefetch=1,
        grid=grid,
        in_specs=[
            pl.BlockSpec((tb, tl), lambda i, j, seed_ref: (i, j)),   # x tile
            pl.BlockSpec((1, tl), lambda i, j, seed_ref: (0, j)),    # pe (shared row)
        ],
        out_specs=pl.BlockSpec((tb, tl), lambda i, j, seed_ref: (i, j)),
    )

    out2 = pl.pallas_call(
        kernel,
        out_shape=jax.ShapeDtypeStruct((B, L), x.dtype),
        grid_spec=grid_spec,
        compiler_params=pltpu.CompilerParams(
            dimension_semantics=("parallel", "parallel"),
            vmem_limit_bytes=32 * 1024 * 1024,
        ),
    )(seed_arr, x2, pe2)

    return out2.reshape(B, S, D)


# ----------------------------------------------------------------------------
# Demo / self-check
# ----------------------------------------------------------------------------
if __name__ == "__main__":
    B, S, D = 2, 8, 32          # batch=2, seq=8 (== max_len), d_model=32
    max_len = S
    p_drop = 0.1

    key = jax.random.PRNGKey(0)
    x = jax.random.normal(key, (B, S, D), dtype=jnp.float32)
    pe = make_positional_encoding(d_model=D, max_len=max_len)

    ref_eval = x + pe           # broadcast over batch (pe[:B] is a no-op slice)

    # 1) eval-mode (dropout disabled) — exact check against pure-JAX reference.
    out_eval = positional_encoding_forward(x, pe, p=p_drop, training=False)
    out_eval = jax.block_until_ready(out_eval)
    assert jnp.allclose(out_eval, ref_eval, atol=1e-6, rtol=1e-6), "eval-mode mismatch"

    # 2) training-mode (dropout applied in-kernel with a deterministic,
    #    grid-invariant hash RNG) — replicate the exact mask on the host.
    seed = 1234
    out_train = positional_encoding_forward(x, pe, p=p_drop, training=True, seed=seed)
    out_train = jax.block_until_ready(out_train)

    L = S * D
    host_bits = _uniform_bits((B, L), jnp.uint32(0), jnp.uint32(0),
                              jnp.uint32(seed), L)
    thr = jnp.uint32(min(int(round(p_drop * 2.0 ** 32)), 0xFFFFFFFF))
    keep = (host_bits >= thr).reshape(B, S, D)
    scale = jnp.float32(1.0 / (1.0 - p_drop))
    ref_train = ref_eval * jnp.where(keep, scale, jnp.float32(0.0))
    assert jnp.allclose(out_train, ref_train, atol=1e-5, rtol=1e-5), (
        "training-mode dropout mismatch"
    )

    print("KERNEL_OK")
</pallas_src>

<mosaic_0001>
module attributes {stable_mosaic.version = 11 : i64} {
  func.func @_pe_dropout_kernel(%arg0: i32, %arg1: i32, %arg2: memref<1xi32, #tpu.memory_space<smem>>, %arg3: memref<2x256xf32, #tpu.memory_space<vmem>>, %arg4: memref<1x256xf32, #tpu.memory_space<vmem>>, %arg5: memref<2x256xf32, #tpu.memory_space<vmem>>) attributes {dimension_semantics = [#tpu.dimension_semantics<parallel>, #tpu.dimension_semantics<parallel>], iteration_bounds = array<i64: 1, 1>, scalar_prefetch = 1 : i64, scratch_operands = 0 : i64, tpu.core_type = #tpu.core_type<tc>, window_params = [{transform_indices = @transform_0, window_bounds = array<i64: 2, 256>}, {transform_indices = @transform_1, window_bounds = array<i64: 1, 256>}, {transform_indices = @transform_2, window_bounds = array<i64: 2, 256>}]} {
    %c0 = arith.constant 0 : index
    %c0_0 = arith.constant 0 : index
    %0 = vector.load %arg3[%c0, %c0_0] : memref<2x256xf32, #tpu.memory_space<vmem>>, vector<2x256xf32>
    %c0_1 = arith.constant 0 : index
    %c0_2 = arith.constant 0 : index
    %1 = vector.load %arg4[%c0_1, %c0_2] : memref<1x256xf32, #tpu.memory_space<vmem>>, vector<1x256xf32>
    %2 = vector.broadcast %1 : vector<1x256xf32> to vector<2x256xf32>
    %3 = arith.addf %0, %2 : vector<2x256xf32>
    %c0_3 = arith.constant 0 : index
    %c0_4 = arith.constant 0 : index
    %4 = vector.load %arg5[%c0_3, %c0_4] : memref<2x256xf32, #tpu.memory_space<vmem>>, vector<2x256xf32>
    tpu.vector_store %arg5[%c0_3, %c0_4], %3 {strides = array<i32>} : memref<2x256xf32, #tpu.memory_space<vmem>>, vector<2x256xf32>,
    return
  }
  func.func @transform_0(%arg0: i32, %arg1: i32, %arg2: memref<1xi32, #tpu.memory_space<smem>>) -> (i32, i32) {
    %c0_i32 = arith.constant 0 : i32
    return %arg0, %arg1 : i32, i32
  }
  func.func @transform_1(%arg0: i32, %arg1: i32, %arg2: memref<1xi32, #tpu.memory_space<smem>>) -> (i32, i32) {
    %c0_i32 = arith.constant 0 : i32
    %c0_i32_0 = arith.constant 0 : i32
    return %c0_i32, %arg1 : i32, i32
  }
  func.func @transform_2(%arg0: i32, %arg1: i32, %arg2: memref<1xi32, #tpu.memory_space<smem>>) -> (i32, i32) {
    %c0_i32 = arith.constant 0 : i32
    return %arg0, %arg1 : i32, i32
  }
}

</mosaic_0001>

<bundles_post_ra>
// kernel: tpu_custom_call.1
= control target key start
LH: loop header
LB: loop body
LE: loop exit
PB: predicated region body
PF: predicated region fallthrough
CT: control target
= control target key end

     0   :  { %9 = vsyncpa [#allocation5], 0  ;;  %s164_s0 = inlined_call_operand.<no memory space> [shape: s32[1], index: 0, kind: input, shape index: {}]   ;;  %s165_s1 = inlined_call_operand.hbm [shape: f32[2,256], index: 1, kind: input, shape index: {}]   ;;  %s166_s2 = inlined_call_operand.vmem [shape: f32[1,256], index: 2, kind: input, shape index: {}]   ;;  %s167_s3 = inlined_call_operand.hbm [shape: f32[2,256], index: 3, kind: output, shape index: {}]  }
   0x1   :  { %10 = vsyncpa [#allocation6], 0  ;;  %s114_s12 = smov [#allocation4]   ;;  %s66_s16 = scalar_lea.hbm %s165_s1, 64 }
   0x2   :  { %s17_s13 = sshll.u32 %s114_s12, 4  ;;  %p67_p0 = scmp.ne.s32.totalorder %s165_s1, %s66_s16  ;;  %s18_s13 = int_to_ptr.vmem [resolvable:$true] %s17_s13 }
   0x3   :  { %p70_p1 = scmp.lt.u32.totalorder %s66_s16, %s165_s1 }
   0x5   :  { %p72_p2 = pnand %p70_p1, %p67_p0 }
   0x7   :  { %75 = shalt.err (!%p72_p2)
}
   0x8   :  { %s76_s20 = scalar_lea.vmem %s18_s13, 64  ;;  %p81_p4 = scmp.lt.s32.totalorder %s18_s13, %s18_s13 }
   0x9   :  { %p77_p3 = scmp.ne.s32.totalorder %s18_s13, %s76_s20  ;;  %p82_p5 = scmp.lt.s32.totalorder %s76_s20, %s76_s20 }
   0xb   :  { %p83_p6 = por %p82_p5, %p81_p4 }
   0xd   :  { %p84_p7 = pnand %p83_p6, %p77_p3 }
   0xf   :  { %87 = shalt.err (!%p84_p7)
}
  0x10   :  { %20 = dma.hbm_to_vmem [thread:$0]  %s165_s1, 64, %s18_s13, [#allocation5]  }
  0x11   :  { %110 = dma.done.wait [#allocation5], 64  }
  0x12   :  { %111 = vsyncadd [#allocation5], 4294967232  ;;  %v29_v0 = vlaneseq  ;;  %v115_v1 = vmov 1983009808   ;;  %v27_v7 = vld [vmem:[%s166_s2] sm:$0x3] }
  0x13   :  { %v39_v2 = vunpack.c.l.s4 %v115_v1  ;;  %v26_v12 = vld [vmem:[#allocation4] sm:$0xf]  ;;  %s116_s25 = smov [#allocation7]  }
  0x14   :  { %v30_v3 = vshrl.u32 %v29_v0, 7  ;;  %s54_s1 = sshll.u32 %s116_s25, 4  ;;  %s55_s1 = int_to_ptr.vmem [resolvable:$true] %s54_s1 }
  0x15   :  { %v40_v6 = vunpack.c.0.s8 %v39_v2  ;;  %s88_s26 = scalar_lea.vmem %s55_s1, 64  ;;  %p93_p9 = scmp.lt.s32.totalorder %s55_s1, %s55_s1 }
  0x16   :  { %v31_v4 = vsub.s32 0, %v30_v3  ;;  %v35_v5 = vsub.s32 1, %v30_v3  ;;  %p89_p8 = scmp.ne.s32.totalorder %s55_s1, %s88_s26  ;;  %p94_p10 = scmp.lt.s32.totalorder %s88_s26, %s88_s26 }
  0x17   :  { %v43_v10 = vsub.s32 %v40_v6, %v30_v3 }
  0x18   :  { %v32_v8 = vrot.slane %v27_v7, %v31_v4  ;;  %v36_v9 = vrot.slane %v27_v7, %v35_v5  ;;  %p95_p11 = por %p94_p10, %p93_p9 }
  0x1a   :  { %v37_v11 = vcombine.low %v32_v8, %v36_v9  ;;  %p96_p12 = pnand %p95_p11, %p89_p8 }
  0x1c   :  { %v44_v13 = vrot.slane %v37_v11, %v43_v10 }
  0x1e   :  { %v46_v14 = vadd.f32 %v44_v13, %v26_v12 }
  0x20   :  { %47 = vst [vmem:[#allocation7] sm:$0xf] %v46_v14 }
  0x21   :  { %99 = shalt.err (!%p96_p12)
}
  0x22   :  { %s100_s28 = scalar_lea.hbm %s167_s3, 64 }
  0x23   :  { %p101_p13 = scmp.ne.s32.totalorder %s167_s3, %s100_s28  ;;  %p104_p0 = scmp.lt.u32.totalorder %s100_s28, %s167_s3 }
  0x25   :  { %p106_p1 = pnand %p104_p0, %p101_p13 }
  0x27   :  { %109 = shalt.err (!%p106_p1)
}
  0x28   :  { %57 = dma.vmem_to_hbm [thread:$0]  %s55_s1, 64, %s167_s3, [#allocation6]  }
  0x29   :  { %112 = dma.done.wait [#allocation6], 64  }
  0x2a   :  { %113 = vsyncadd [#allocation6], 4294967232 }
  0x2b   :  { %61 = vsyncpa [#allocation5], 1 }
  0x2c   :  { %62 = vsyncpa [#allocation6], 1 }

</bundles_post_ra>
